<compile_context>
chip_gen: v5e
topology: v5e:2x2
jax: 0.10.0
libtpu: 0.0.40
codegen_flags: <defaults>
</compile_context>

<pallas_src>
import jax
import jax.numpy as jnp
from jax.experimental import pallas as pl
from jax.experimental.pallas import tpu as pltpu

_LANE = 128
_TILE_CAP = 65536  # lane-dense spatial tile (elements); ~256*T bytes VMEM double-buffered


def _round_up_lane(x):
    return ((x + _LANE - 1) // _LANE) * _LANE


# ---------------------------------------------------------------------------
# shade kernel: elementwise shading over lane-dense spatial tiles
# ---------------------------------------------------------------------------
def _shade_kernel(params_ref, normal_ref, kd_ref, shaded_ref, shading_ref):
    # params_ref : (5,)    SMEM  [ld_x, ld_y, ld_z, amb, diff]  (constant per batch)
    # normal_ref : (3, T)  VMEM block
    # kd_ref     : (3, T)  VMEM block
    # shaded_ref : (3, T)  VMEM block
    # shading_ref: (1, T)  VMEM block
    ld0 = params_ref[0]
    ld1 = params_ref[1]
    ld2 = params_ref[2]
    amb = params_ref[3]
    diff = params_ref[4]

    n = normal_ref[...].astype(jnp.float32)                   # (3, T)
    d = n[0:1] * ld0 + n[1:2] * ld1 + n[2:3] * ld2             # (1, T) dot over channels
    shading = amb + diff * jnp.maximum(d, 0.0)                 # (1, T), f32

    shading_ref[...] = shading.astype(shading_ref.dtype)
    shaded_ref[...] = (shading * kd_ref[...].astype(jnp.float32)).astype(shaded_ref.dtype)


def _shade_pallas(params_5, kd, normal):
    B, C, H, W = kd.shape
    assert C == 3 and normal.shape == (B, 3, H, W)
    HW = H * W
    dtype = kd.dtype

    # Lane-dense spatial tiling: T a multiple of 128, capped so the double-buffered
    # VMEM working set (~256*T bytes with 8-sublane padding) stays well below the
    # 32 MiB scoped limit (and far below v7x's 64 MiB physical VMEM).
    hw_lane = _round_up_lane(HW)
    T = min(_TILE_CAP, hw_lane)
    n_tiles = pl.cdiv(HW, T)
    # v7x: ensure at least 2 total parallel grid steps so both TensorCores get work.
    while B * n_tiles < 2 and T > _LANE:
        T = max(_LANE, _round_up_lane(T // 2))
        n_tiles = pl.cdiv(HW, T)

    # Free views (contiguous reshape); no padding, no extra HBM copies.
    kd_f = kd.reshape(B, 3, HW)
    nm_f = normal.reshape(B, 3, HW)

    grid_spec = pltpu.PrefetchScalarGridSpec(
        num_scalar_prefetch=0,
        grid=(B, n_tiles),
        in_specs=[
            pl.BlockSpec(memory_space=pltpu.MemorySpace.SMEM),          # (5,) light params
            pl.BlockSpec((None, 3, T), lambda b, s: (b, 0, s)),         # normal
            pl.BlockSpec((None, 3, T), lambda b, s: (b, 0, s)),         # kd
        ],
        out_specs=[
            pl.BlockSpec((None, 3, T), lambda b, s: (b, 0, s)),         # shaded
            pl.BlockSpec((None, 1, T), lambda b, s: (b, 0, s)),         # shading
        ],
    )
    shaded_f, shading_f = pl.pallas_call(
        _shade_kernel,
        out_shape=(jax.ShapeDtypeStruct((B, 3, HW), dtype),
                   jax.ShapeDtypeStruct((B, 1, HW), dtype)),
        grid_spec=grid_spec,
        compiler_params=pltpu.CompilerParams(
            dimension_semantics=("parallel", "parallel"),
            vmem_limit_bytes=32 * 1024 * 1024,
        ),
    )(params_5, nm_f, kd_f)

    shaded = shaded_f.reshape(B, 3, H, W)
    shading = shading_f.reshape(B, 1, H, W)
    return shaded, shading


# ---------------------------------------------------------------------------
# Module wrapper (mirrors the PyTorch module)
# ---------------------------------------------------------------------------
class FixedDirectionLight:
    def __init__(self, direction, amb, diff):
        self.light_dir = direction          # (3,) float32
        self.amb = amb
        self.diff = diff
        self.is_hacking = not (isinstance(self.amb, float) or isinstance(self.amb, int))

    def _params(self):
        return jnp.concatenate(
            [jnp.asarray(self.light_dir, jnp.float32),
             jnp.array([self.amb, self.diff], dtype=jnp.float32)])      # (5,)

    def forward(self, feat):
        batch_size = feat.shape[0]
        if self.is_hacking:
            # glue: trivial concat of caller-supplied tensors (no batch expansion).
            return jnp.concatenate([self.light_dir, self.amb, self.diff], -1)
        # ~20*B bytes of output: plain broadcast, no pallas_call (launch overhead >> work).
        return jnp.broadcast_to(self._params()[None, :], (batch_size, 5))

    def shade(self, feat, kd, normal):
        # Non-hacking case: light params are identical for every batch element, so the
        # (B, 5) broadcast is skipped and a single (5,) SMEM vector is passed.
        # TODO(synk): hacking case (tensor-valued amb/diff, per-batch params) would need
        #             per-batch scalar loads; not exercised by this module's usage.
        assert not self.is_hacking
        del feat
        return _shade_pallas(self._params(), kd, normal)


# ---------------------------------------------------------------------------
def _check_shade(light, direction, amb, diff, kd, normal, tag):
    shaded, shading = light.shade(None, kd, normal)
    jax.block_until_ready((shaded, shading))
    d_ref = jnp.sum(direction[None, :, None, None] * normal, axis=1, keepdims=True)
    shading_ref = amb + diff * jnp.maximum(d_ref, 0.0)
    shaded_ref = shading_ref * kd
    assert shaded.shape == kd.shape and shading.shape == d_ref.shape
    assert jnp.allclose(shading, shading_ref, atol=1e-5), f"shading mismatch ({tag})"
    assert jnp.allclose(shaded, shaded_ref, atol=1e-5), f"shaded mismatch ({tag})"


if __name__ == "__main__":
    key = jax.random.PRNGKey(0)
    B, H, W = 2, 16, 16

    # deterministic "parameters" implied by __init__: a unit light direction + floats
    direction = jnp.array([0.3, 0.4, 0.5], dtype=jnp.float32)
    direction = direction / jnp.linalg.norm(direction)
    amb, diff = 0.3, 0.7

    k_feat, k_n, k_kd, k_n2, k_kd2 = jax.random.split(key, 5)
    feat = jax.random.normal(k_feat, (B, 4, H, W), dtype=jnp.float32)   # only batch dim used
    normal = jax.random.normal(k_n, (B, 3, H, W), dtype=jnp.float32)
    normal = normal / jnp.linalg.norm(normal, axis=1, keepdims=True)
    kd = jax.random.uniform(k_kd, (B, 3, H, W), dtype=jnp.float32)

    light = FixedDirectionLight(direction, amb, diff)

    # forward
    out = light.forward(feat)
    jax.block_until_ready(out)
    ref_out = jnp.broadcast_to(
        jnp.concatenate([direction, jnp.array([amb, diff], jnp.float32)])[None, :], (B, 5))
    assert out.shape == (B, 5) and out.dtype == jnp.float32
    assert jnp.allclose(out, ref_out, atol=1e-6), "forward mismatch"

    # shade (hot path), aligned spatial size (HW multiple of 128)
    _check_shade(light, direction, amb, diff, kd, normal, "aligned")

    # shade, ragged spatial size (HW not a multiple of 128 -> masked last block path)
    Hr, Wr = 10, 13
    normal_r = jax.random.normal(k_n2, (B, 3, Hr, Wr), dtype=jnp.float32)
    normal_r = normal_r / jnp.linalg.norm(normal_r, axis=1, keepdims=True)
    kd_r = jax.random.uniform(k_kd2, (B, 3, Hr, Wr), dtype=jnp.float32)
    _check_shade(light, direction, amb, diff, kd_r, normal_r, "ragged")

    print("KERNEL_OK")
</pallas_src>

<mosaic_0001>
module attributes {stable_mosaic.version = 11 : i64} {
  func.func @_shade_kernel(%arg0: i32, %arg1: i32, %arg2: memref<5xf32, #tpu.memory_space<smem>>, %arg3: memref<1x3x256xf32, #tpu.memory_space<vmem>>, %arg4: memref<1x3x256xf32, #tpu.memory_space<vmem>>, %arg5: memref<1x3x256xf32, #tpu.memory_space<vmem>>, %arg6: memref<1x1x256xf32, #tpu.memory_space<vmem>>) attributes {dimension_semantics = [#tpu.dimension_semantics<parallel>, #tpu.dimension_semantics<parallel>], iteration_bounds = array<i64: 2, 1>, scalar_prefetch = 0 : i64, scratch_operands = 0 : i64, tpu.core_type = #tpu.core_type<tc>, window_params = [{transform_indices = @transform_0, window_bounds = array<i64: 5>}, {transform_indices = @transform_1, window_bounds = array<i64: 1, 3, 256>}, {transform_indices = @transform_2, window_bounds = array<i64: 1, 3, 256>}, {transform_indices = @transform_3, window_bounds = array<i64: 1, 3, 256>}, {transform_indices = @transform_4, window_bounds = array<i64: 1, 1, 256>}]} {
    %c0 = arith.constant 0 : index
    %0 = memref.load %arg2[%c0] : memref<5xf32, #tpu.memory_space<smem>>
    %c1 = arith.constant 1 : index
    %1 = memref.load %arg2[%c1] : memref<5xf32, #tpu.memory_space<smem>>
    %c2 = arith.constant 2 : index
    %2 = memref.load %arg2[%c2] : memref<5xf32, #tpu.memory_space<smem>>
    %c3 = arith.constant 3 : index
    %3 = memref.load %arg2[%c3] : memref<5xf32, #tpu.memory_space<smem>>
    %c4 = arith.constant 4 : index
    %4 = memref.load %arg2[%c4] : memref<5xf32, #tpu.memory_space<smem>>
    %c0_0 = arith.constant 0 : index
    %c0_1 = arith.constant 0 : index
    %c0_2 = arith.constant 0 : index
    %5 = vector.load %arg3[%c0_0, %c0_1, %c0_2] : memref<1x3x256xf32, #tpu.memory_space<vmem>>, vector<1x3x256xf32>
    %6 = vector.shape_cast %5 : vector<1x3x256xf32> to vector<3x256xf32>
    %7 = vector.extract_strided_slice %6 {offsets = [0, 0], sizes = [1, 256], strides = [1, 1]} : vector<3x256xf32> to vector<1x256xf32>
    %8 = vector.broadcast %0 : f32 to vector<1x256xf32>
    %9 = arith.mulf %7, %8 : vector<1x256xf32>
    %10 = vector.extract_strided_slice %6 {offsets = [1, 0], sizes = [1, 256], strides = [1, 1]} : vector<3x256xf32> to vector<1x256xf32>
    %11 = vector.broadcast %1 : f32 to vector<1x256xf32>
    %12 = arith.mulf %10, %11 : vector<1x256xf32>
    %13 = arith.addf %9, %12 : vector<1x256xf32>
    %14 = vector.extract_strided_slice %6 {offsets = [2, 0], sizes = [1, 256], strides = [1, 1]} : vector<3x256xf32> to vector<1x256xf32>
    %15 = vector.broadcast %2 : f32 to vector<1x256xf32>
    %16 = arith.mulf %14, %15 : vector<1x256xf32>
    %17 = arith.addf %13, %16 : vector<1x256xf32>
    %cst = arith.constant 0.000000e+00 : f32
    %18 = vector.broadcast %cst : f32 to vector<1x256xf32>
    %19 = arith.maximumf %17, %18 : vector<1x256xf32>
    %20 = vector.broadcast %4 : f32 to vector<1x256xf32>
    %21 = arith.mulf %20, %19 : vector<1x256xf32>
    %22 = vector.broadcast %3 : f32 to vector<1x256xf32>
    %23 = arith.addf %22, %21 : vector<1x256xf32>
    %c0_3 = arith.constant 0 : index
    %c0_4 = arith.constant 0 : index
    %c0_5 = arith.constant 0 : index
    %24 = vector.load %arg6[%c0_3, %c0_4, %c0_5] : memref<1x1x256xf32, #tpu.memory_space<vmem>>, vector<1x1x256xf32>
    %25 = vector.shape_cast %24 : vector<1x1x256xf32> to vector<1x256xf32>
    %26 = vector.shape_cast %23 : vector<1x256xf32> to vector<1x1x256xf32>
    tpu.vector_store %arg6[%c0_3, %c0_4, %c0_5], %26 {strides = array<i32>} : memref<1x1x256xf32, #tpu.memory_space<vmem>>, vector<1x1x256xf32>,
    %c0_6 = arith.constant 0 : index
    %c0_7 = arith.constant 0 : index
    %c0_8 = arith.constant 0 : index
    %27 = vector.load %arg4[%c0_6, %c0_7, %c0_8] : memref<1x3x256xf32, #tpu.memory_space<vmem>>, vector<1x3x256xf32>
    %28 = vector.shape_cast %27 : vector<1x3x256xf32> to vector<3x256xf32>
    %29 = vector.broadcast %23 : vector<1x256xf32> to vector<3x256xf32>
    %30 = arith.mulf %29, %28 : vector<3x256xf32>
    %c0_9 = arith.constant 0 : index
    %c0_10 = arith.constant 0 : index
    %c0_11 = arith.constant 0 : index
    %31 = vector.load %arg5[%c0_9, %c0_10, %c0_11] : memref<1x3x256xf32, #tpu.memory_space<vmem>>, vector<1x3x256xf32>
    %32 = vector.shape_cast %31 : vector<1x3x256xf32> to vector<3x256xf32>
    %33 = vector.shape_cast %30 : vector<3x256xf32> to vector<1x3x256xf32>
    tpu.vector_store %arg5[%c0_9, %c0_10, %c0_11], %33 {strides = array<i32>} : memref<1x3x256xf32, #tpu.memory_space<vmem>>, vector<1x3x256xf32>,
    return
  }
  func.func @transform_0(%arg0: i32, %arg1: i32) -> i32 {
    %c0_i32 = arith.constant 0 : i32
    %c0_i32_0 = arith.constant 0 : i32
    return %c0_i32 : i32
  }
  func.func @transform_1(%arg0: i32, %arg1: i32) -> (i32, i32, i32) {
    %c0_i32 = arith.constant 0 : i32
    %c0_i32_0 = arith.constant 0 : i32
    return %arg0, %c0_i32, %arg1 : i32, i32, i32
  }
  func.func @transform_2(%arg0: i32, %arg1: i32) -> (i32, i32, i32) {
    %c0_i32 = arith.constant 0 : i32
    %c0_i32_0 = arith.constant 0 : i32
    return %arg0, %c0_i32, %arg1 : i32, i32, i32
  }
  func.func @transform_3(%arg0: i32, %arg1: i32) -> (i32, i32, i32) {
    %c0_i32 = arith.constant 0 : i32
    %c0_i32_0 = arith.constant 0 : i32
    return %arg0, %c0_i32, %arg1 : i32, i32, i32
  }
  func.func @transform_4(%arg0: i32, %arg1: i32) -> (i32, i32, i32) {
    %c0_i32 = arith.constant 0 : i32
    %c0_i32_0 = arith.constant 0 : i32
    return %arg0, %c0_i32, %arg1 : i32, i32, i32
  }
}

</mosaic_0001>

<bundles_post_ra>
// kernel: tpu_custom_call.1
= control target key start
LH: loop header
LB: loop body
LE: loop exit
PB: predicated region body
PF: predicated region fallthrough
CT: control target
= control target key end

     0   :  { %10 = vsyncpa [#allocation4], 0  ;;  %s865_s0 = inlined_call_operand.vmem [shape: f32[5], index: 0, kind: input, shape index: {}]   ;;  %s866_s1 = inlined_call_operand.vmem [shape: f32[2,3,256], index: 1, kind: input, shape index: {}]   ;;  %s867_s2 = inlined_call_operand.vmem [shape: f32[2,3,256], index: 2, kind: input, shape index: {}]   ;;  %s868_s3 = inlined_call_operand.vmem [shape: f32[2,3,256], index: 3, kind: output, shape index: {0}]   ;;  %s869_s4 = inlined_call_operand.hbm [shape: f32[2,1,256], index: 4, kind: output, shape index: {1}]  }
   0x1   :  { %11 = vsyncpa [#allocation3], 0 }
   0x2   :  { %13 = vsyncpa [#allocation3 + $0x1], 0  ;;  %s751_s15 = smov 0   ;;  %s753_s16 = smov 0  }
   0x3   :  { %s755_s17 = smov 0   ;;  %s757_s18 = smov 0  }
   0x4   :  { %s759_s19 = smov 0   ;;  %s761_s20 = smov 0  }
   0x5 LB: > { %s533_s21 = sadd.s32 4294967295, %s723_s20   ;;  %s534_s22 = sadd.s32 4294967294, %s723_s20   ;;  %s723_s20 = sphi %s761_s20, %s19_s20   ;;  %s719_s19 = sphi %s759_s19, %s876_s19   ;;  %s715_s18 = sphi %s757_s18, %s875_s18   ;;  %s711_s17 = sphi %s755_s17, %s874_s17   ;;  %s707_s16 = sphi %s753_s16, %s873_s16   ;;  %s703_s15 = sphi %s751_s15, %s872_s15  }
   0x6   : > { %s31_s23 = sadd.s32 1, %s719_s19  ;;  %s145_s24 = sadd.s32 1, %s711_s17 }
   0x7   : > { %p33_p0 = scmp.ge.s32.totalorder %s31_s23, 2  ;;  %p155_p1 = scmp.ne.s32.totalorder %s711_s17, %s707_s16 }
   0x8   : > { %p156_p2 = scmp.eq.s32.totalorder %s533_s21, 1  ;;  %p161_p3 = scmp.ne.s32.totalorder %s707_s16, %s703_s15 }
   0x9   : > { %s878_s23 = smov (%p33_p0, %s31_s23), 0  ;;  %p162_p5 = scmp.eq.s32.totalorder %s534_s22, 1 }
   0xa   : > { %p791_p4 = por %p156_p2, %p155_p1  ;;  %s140_s26 = ssub.s32 %s719_s19, %s878_s23 }
   0xb   : > { %p535_p6 = scmp.ge.s32.totalorder %s723_s20, 1  ;;  %p143_p7 = scmp.eq.s32.totalorder %s140_s26, 0 }
   0xc   : > { %p798_p8 = por %p162_p5, %p161_p3  ;;  %p169_p9 = scmp.lt.s32.totalorder %s723_s20, 3 }
   0xd   : > { %s804_s28 = scalar_select %p143_p7, %s711_s17, %s145_s24  }
   0xe   : > { %p170_p10 = pnand %p535_p6, %p169_p9  ;;  %p574_p11 = scmp.eq.s32.totalorder %s533_s21, 0 }
   0xf   : > { %s181_s5 = sshll.u32 %s865_s0, 4  ;;  %s725_s6 = smov [#allocation2]   ;;  %s182_s5 = int_to_ptr.vmem [resolvable:$true] %s181_s5 }
  0x10   : > { %p566_p12 = pneg %p170_p10  ;;  %220 = sbr.rel (%p170_p10) target bundleno = 56 (0x38), region = 32 }
  0x12   : > { %p567_p13 = pnand %p574_p11, %p566_p12 }
  0x14   : > { %569 = dma.vmem_to_smem (!%p567_p13), %s182_s5, 16, %s725_s6, [#allocation4]  }
  0x15   : > { %694 = dma.done.wait (%p574_p11), [#allocation4], 16  }
  0x16   : > { %696 = vsyncadd (%p574_p11), [#allocation4], 4294967280 }
  0x17   : > { %227 = sfence }
  0x18   : > { %p271_p0 = scmp.lt.s32.totalorder %s715_s18, 1  ;;  %s301_s7 = sld [smem:[#allocation2]]  ;;  %v333_v16 = vlaneseq  ;;  %vm330_vm0 = vcmask 1040384  }
  0x19   : > { %s547_s8 = sld [smem:[#allocation2 + $0x1]]  ;;  %s267_s30 = sand.u32 1, %s707_s16  }
  0x1a   : > { %s272_s9 = scalar_select %p271_p0, %s715_s18, 1  ;;  %vm335_vm1 = vcmp.lt.s32.totalorder %v333_v16, 256 }
  0x1b   : > { %s548_s10 = sld [smem:[#allocation2 + $0x2]]  ;;  %s540_s5 = sshll.u32 %s267_s30, 1 }
  0x1c   : > { %s811_s11 = sshll.u32 %s272_s9, 3  ;;  %s550_s26 = sld [smem:[#allocation2 + $0x4]] }
  0x1d   : > { %s278_s14 = scalar_lea.vmem %s866_s1, %s811_s11  ;;  %s288_s24 = scalar_lea.vmem %s867_s2, %s811_s11 }
  0x1e   : > { %v306_v0 = vld [vmem:[%s278_s14] sm:$0x77]  ;;  %v307_v1 = vstv %s301_s7  ;;  %s549_s29 = sld [smem:[#allocation2 + $0x3]]  ;;  %s554_s6 = sshll.u32 %s715_s18, 1 }
  0x1f   : > { %v338_v2 = vld [vmem:[%s288_s24] sm:$0x77]  ;;  %v309_v3 = vstv %s547_s8  ;;  %v308_v4 = vmul.f32 %v307_v1, %v306_v0  ;;  %s386_s8 = scalar_lea.hbm %s869_s4, %s554_s6  ;;  %s269_s12 = scalar_lea.vmem [#allocation5], %s540_s5 }
  0x20   : > { %346 = vst [vmem:[#allocation1] ss:$2 sm:$0xff] %v338_v2  ;;  %v310_v5 = vmul.f32 %v309_v3, %v306_v0  ;;  %s390_s13 = sshll.u32 %s386_s8, 4  ;;  %s370_s18 = scalar_lea.sflag [#allocation3], %s267_s30  ;;  %s391_s13 = int_to_ptr.hbm [resolvable:$true] %s390_s13 }
  0x21   : > { %v316_v6 = vstv %s548_s10  ;;  %s826_s10 = sshll.u32 %s269_s12, 4  ;;  %s655_s14 = sshra.s32 %s391_s13, 4  ;;  %s389_s10 = int_to_ptr.vmem [resolvable:$true] %s826_s10  ;;  %s656_s14 = int_to_ptr.hbm [resolvable:$true] %s655_s14 }
  0x22   : > { %v551_v7 = vrot.slane %v310_v5, 9  ;;  %v317_v8 = vmul.f32 %v316_v6, %v306_v0  ;;  %v324_v12 = vstv %s550_s26  ;;  %s657_s21 = scalar_lea.hbm %s656_s14, 2  ;;  %s661_s26 = scalar_lea.hbm %s869_s4, 4 }
  0x23   : > { %p658_p1 = scmp.ne.s32.totalorder %s656_s14, %s657_s21  ;;  %p662_p5 = scmp.lt.s32.totalorder %s656_s14, %s869_s4 }
  0x24   : > { %v315_v9 = vadd.f32 %v551_v7, %v308_v4  ;;  %v552_v10 = vrot.slane %v317_v8, 10  ;;  %v326_v14 = vstv %s549_s29  ;;  %p663_p6 = scmp.lt.s32.totalorder %s661_s26, %s657_s21 }
  0x25   : > { %p659_p2 = pnand %p658_p1, %p791_p4 }
  0x26   : > { %v322_v11 = vadd.f32 %v552_v10, %v315_v9  ;;  %p664_p7 = por %p663_p6, %p662_p5 }
  0x27   : > { %v348_v21 = vld.sshfl [vmem:[#allocation1 + $0x8] sm:$0xff pattern:$0x75316420]  ;;  %v347_v25 = vld.sshfl [vmem:[#allocation1] sm:$0xff pattern:$0x75316420]  ;;  %p660_p3 = pneg %p659_p2 }
  0x28   : > { %v323_v13 = vmax.f32 %v322_v11, 0.0 }
  0x29   : > { %p665_p9 = pnand %p664_p7, %p660_p3 }
  0x2a   : > { %v325_v15 = vmul.f32 %v324_v12, %v323_v13 }
  0x2c   : > { %v327_v17 = vadd.f32 %v326_v14, %v325_v15 }
  0x2e   : > { %v329_v18 = vrot.slane %v327_v17, 3  ;;  %v339_v19 = vperm.slane %v327_v17, 0  ;;  %v340_v20 = vperm.slane %v327_v17, 4 }
  0x30   : > { %v331_v22 = vsel %vm330_vm0, %v327_v17, %v329_v18  ;;  %v343_v23 = vperm.slane %v339_v19, 0  ;;  %v344_v24 = vperm.slane %v340_v20, 0 }
  0x31   : > { %337 = vst.msk [vmem:[%s269_s12] sm:$0x3] %vm335_vm1, %v331_v22 }
  0x32   : > { %v352_v26 = vmul.f32 %v348_v21, %v344_v24 }
  0x33   : > { %668 = shalt.err (!%p665_p9)
}
  0x34   : > { %564 = dma.vmem_to_hbm [thread:$0]  (%p791_p4), %s389_s10, 32, %s391_s13, %s370_s18   ;;  %vm356_vm2 = vcmask 1043456   ;;  %v351_v27 = vmul.f32 %v347_v25, %v343_v23  ;;  %v355_v28 = vrot.slane %v352_v26, 4 }
  0x35   : > { %s298_s7 = scalar_lea.vmem %s868_s3, %s811_s11 }
  0x36   : > { %v357_v29 = vsel %vm356_vm2, %v351_v27, %v355_v28 }
  0x37   : > { %359 = vst [vmem:[%s298_s7] sm:$0x77] %v357_v29 }
  0x38 PF: > { %p576_p10 = scmp.ge.s32.totalorder %s723_s20, 2  ;;  %s414_s9 = sand.u32 1, %s703_s15  }
  0x39   : > { %s415_s25 = scalar_lea.sflag [#allocation3], %s414_s9 }
  0x3a   : > { %p571_p11 = pnand %p576_p10, %p798_p8 }
  0x3c   : > { %p572_p12 = pneg %p571_p11 }
  0x3e   : > { %698 = dma.done.wait (%p572_p12), %s415_s25, 32  }
  0x3f   : > { %700 = vsyncadd (%p572_p12), %s415_s25, 4294967264  ;;  %s19_s20 = sadd.s32 1, %s723_s20   ;;  %s872_s15 = smov %s707_s16 }
  0x40   : > { %p16_p4 = scmp.ge.s32.totalorder %s19_s20, 4   ;;  %s873_s16 = smov %s711_s17 }
  0x41   : > { %s874_s17 = smov %s804_s28  ;;  %s875_s18 = smov %s719_s19 }
  0x42   : > { %s876_s19 = smov %s878_s23  ;;  %18 = sbr.rel (!%p16_p4) target bundleno = 5 (0x5), region = 87 }
  0x47   :  { %421 = vsyncpa [#allocation3], 1 }
  0x48   :  { %423 = vsyncpa [#allocation3 + $0x1], 1 }
  0x49   :  { %424 = vsyncpa [#allocation4], 1 }
  0x4a   :  { %426 = vsyncpa [#allocation4 + $0x1], 1 }

</bundles_post_ra>
